<compile_context>
chip_gen: v7x
topology: tpu7x:2x2x1
jax: 0.10.0
libtpu: 0.0.40
codegen_flags: <defaults>
</compile_context>

<pallas_src>
import functools

import jax
import jax.numpy as jnp
from jax import lax
from jax.experimental import pallas as pl
from jax.experimental.pallas import tpu as pltpu

HIDDEN = 32          # hidden_size of the AddNorm module
DROPOUT_P = 0.1      # dropout probability passed to AddNorm(hidden_size, dropout)

LANE_COLS = 512      # lane-dense last dim (multiple of 128)
ROW_TILE_MAX = 1024  # up to (1024, 512) f32 = 2 MiB per array per grid step


def _wrap_i32(v):
    """Python int -> equivalent two's-complement int32 value."""
    v &= 0xFFFFFFFF
    return v - (1 << 32) if v >= (1 << 31) else v


_MIX1 = _wrap_i32(0x7FEB352D)    # lowbias32 hash constants
_MIX2 = _wrap_i32(0x846CA68B)
_GOLDEN = _wrap_i32(0x9E3779B9)


def _srl(v, k):
    """Logical right shift on int32 values."""
    return lax.shift_right_logical(v, jnp.int32(k))


def _addnorm_kernel(seed_ref, x_ref, y_ref, o_ref, *, keep_threshold, inv_keep,
                    row_tile, cols):
    """out = inverted_dropout(Y) + X for one (row_tile, cols) tile."""
    x = x_ref[...]
    y = y_ref[...]

    # --- counter-based PRNG: lowbias32 hash of (global element index, seed) ---
    base = pl.program_id(0) * jnp.int32(row_tile * cols)
    row = lax.broadcasted_iota(jnp.int32, (row_tile, cols), 0)
    col = lax.broadcasted_iota(jnp.int32, (row_tile, cols), 1)
    v = (base + row * jnp.int32(cols) + col) ^ (seed_ref[0] * jnp.int32(_GOLDEN))
    v = v ^ _srl(v, 16)
    v = v * jnp.int32(_MIX1)
    v = v ^ _srl(v, 15)
    v = v * jnp.int32(_MIX2)
    v = v ^ _srl(v, 16)
    r24 = _srl(v, 8)                                  # uniform in [0, 2^24)
    keep = r24 >= jnp.int32(keep_threshold)           # P(keep) = 1 - p

    scale = jnp.asarray(inv_keep, dtype=y.dtype)
    dropped_y = jnp.where(keep, y * scale, jnp.zeros_like(y))
    o_ref[...] = (dropped_y + x).astype(o_ref.dtype)


def _round_up(a, b):
    return (a + b - 1) // b * b


def add_norm(x, y, *, p=DROPOUT_P, seed=0, training=True):
    """AddNorm.forward(X, Y) == dropout(Y) + X (the module's LayerNorm is unused)."""
    assert x.shape == y.shape and x.dtype == y.dtype

    if (not training) or float(p) == 0.0:
        # Dropout is the identity in eval mode; let XLA fuse the plain add.
        return x + y

    orig_shape = x.shape
    n = x.size

    # Lane-dense re-layout: flatten and pad to a (rows_padded, LANE_COLS) slab.
    cols = LANE_COLS
    rows = -(-n // cols)
    row_tile = min(ROW_TILE_MAX, _round_up(rows, 8))
    rows_padded = _round_up(rows, row_tile)
    pad = rows_padded * cols - n

    xflat = x.reshape(-1)
    yflat = y.reshape(-1)
    if pad:
        xflat = jnp.pad(xflat, (0, pad))
        yflat = jnp.pad(yflat, (0, pad))
    xf = xflat.reshape(rows_padded, cols)
    yf = yflat.reshape(rows_padded, cols)

    seed_arr = jnp.asarray([seed], dtype=jnp.int32)
    keep_threshold = int(round(float(p) * (1 << 24)))

    kernel = functools.partial(
        _addnorm_kernel,
        keep_threshold=keep_threshold,
        inv_keep=1.0 / (1.0 - float(p)),
        row_tile=row_tile,
        cols=cols,
    )

    out = pl.pallas_call(
        kernel,
        out_shape=jax.ShapeDtypeStruct((rows_padded, cols), x.dtype),
        grid_spec=pltpu.PrefetchScalarGridSpec(
            num_scalar_prefetch=1,                   # seed lands in SMEM
            grid=(rows_padded // row_tile,),
            in_specs=[
                pl.BlockSpec((row_tile, cols), lambda i, seed: (i, 0)),
                pl.BlockSpec((row_tile, cols), lambda i, seed: (i, 0)),
            ],
            out_specs=pl.BlockSpec((row_tile, cols), lambda i, seed: (i, 0)),
        ),
        compiler_params=pltpu.CompilerParams(
            # Mask depends only on the global element index -> any iteration
            # order is fine; lets Mosaic shard the row loop across both TCs
            # on v7x (neutral on v5e/v6e).
            dimension_semantics=("parallel",),
        ),
    )(seed_arr, xf, yf)

    return out.reshape(-1)[:n].reshape(orig_shape)


if __name__ == "__main__":
    key = jax.random.PRNGKey(0)
    kx, ky = jax.random.split(key)

    batch, seq, hidden = 2, 8, HIDDEN          # small shapes, consistent with the module
    x = jax.random.normal(kx, (batch, seq, hidden), dtype=jnp.float32)
    y = jax.random.normal(ky, (batch, seq, hidden), dtype=jnp.float32)

    # Training-mode run (dropout active, deterministic via seed).
    out_train = add_norm(x, y, p=DROPOUT_P, seed=1234, training=True)
    out_train = jax.block_until_ready(out_train)
    assert out_train.shape == x.shape and out_train.dtype == x.dtype

    # Every element must be either X (dropped) or X + Y/(1-p) (kept).
    resid = out_train - x
    kept = jnp.isclose(resid, y / (1.0 - DROPOUT_P), atol=1e-5)
    dropped = jnp.isclose(resid, 0.0, atol=1e-6)
    assert bool(jnp.all(kept | dropped)), "training-mode element mismatch"

    # Eval-mode run: dropout is identity, output must equal X + Y.
    out_eval = add_norm(x, y, p=DROPOUT_P, seed=1234, training=False)
    out_eval = jax.block_until_ready(out_eval)
    assert jnp.allclose(out_eval, x + y, atol=1e-6), "eval-mode mismatch"

    print("KERNEL_OK")
</pallas_src>

<mosaic_0001>
module attributes {stable_mosaic.version = 11 : i64} {
  func.func @_addnorm_kernel(%arg0: i32, %arg1: memref<1xi32, #tpu.memory_space<smem>>, %arg2: memref<8x512xf32, #tpu.memory_space<vmem>>, %arg3: memref<8x512xf32, #tpu.memory_space<vmem>>, %arg4: memref<8x512xf32, #tpu.memory_space<vmem>>) attributes {dimension_semantics = [#tpu.dimension_semantics<parallel>], iteration_bounds = array<i64: 1>, scalar_prefetch = 1 : i64, scratch_operands = 0 : i64, tpu.core_type = #tpu.core_type<tc>, window_params = [{transform_indices = @transform_0, window_bounds = array<i64: 8, 512>}, {transform_indices = @transform_1, window_bounds = array<i64: 8, 512>}, {transform_indices = @transform_2, window_bounds = array<i64: 8, 512>}]} {
    %c0 = arith.constant 0 : index
    %c0_0 = arith.constant 0 : index
    %0 = vector.load %arg2[%c0, %c0_0] : memref<8x512xf32, #tpu.memory_space<vmem>>, vector<8x512xf32>
    %c0_1 = arith.constant 0 : index
    %c0_2 = arith.constant 0 : index
    %1 = vector.load %arg3[%c0_1, %c0_2] : memref<8x512xf32, #tpu.memory_space<vmem>>, vector<8x512xf32>
    %c4096_i32 = arith.constant 4096 : i32
    %2 = arith.muli %arg0, %c4096_i32 : i32
    %3 = tpu.iota {dimensions = array<i32: 0>} : vector<8x512xi32>
    %4 = tpu.iota {dimensions = array<i32: 1>} : vector<8x512xi32>
    %c512_i32 = arith.constant 512 : i32
    %5 = vector.broadcast %c512_i32 : i32 to vector<8x512xi32>
    %6 = arith.muli %3, %5 : vector<8x512xi32>
    %7 = vector.broadcast %2 : i32 to vector<8x512xi32>
    %8 = arith.addi %7, %6 : vector<8x512xi32>
    %9 = arith.addi %8, %4 : vector<8x512xi32>
    %c0_3 = arith.constant 0 : index
    %10 = memref.load %arg1[%c0_3] : memref<1xi32, #tpu.memory_space<smem>>
    %c-1640531527_i32 = arith.constant -1640531527 : i32
    %11 = arith.muli %10, %c-1640531527_i32 : i32
    %12 = vector.broadcast %11 : i32 to vector<8x512xi32>
    %13 = arith.xori %9, %12 : vector<8x512xi32>
    %c16_i32 = arith.constant 16 : i32
    %14 = vector.broadcast %c16_i32 : i32 to vector<8x512xi32>
    %15 = arith.shrui %13, %14 : vector<8x512xi32>
    %16 = arith.xori %13, %15 : vector<8x512xi32>
    %c2146121005_i32 = arith.constant 2146121005 : i32
    %17 = vector.broadcast %c2146121005_i32 : i32 to vector<8x512xi32>
    %18 = arith.muli %16, %17 : vector<8x512xi32>
    %c15_i32 = arith.constant 15 : i32
    %19 = vector.broadcast %c15_i32 : i32 to vector<8x512xi32>
    %20 = arith.shrui %18, %19 : vector<8x512xi32>
    %21 = arith.xori %18, %20 : vector<8x512xi32>
    %c-2073254261_i32 = arith.constant -2073254261 : i32
    %22 = vector.broadcast %c-2073254261_i32 : i32 to vector<8x512xi32>
    %23 = arith.muli %21, %22 : vector<8x512xi32>
    %c16_i32_4 = arith.constant 16 : i32
    %24 = vector.broadcast %c16_i32_4 : i32 to vector<8x512xi32>
    %25 = arith.shrui %23, %24 : vector<8x512xi32>
    %26 = arith.xori %23, %25 : vector<8x512xi32>
    %c8_i32 = arith.constant 8 : i32
    %27 = vector.broadcast %c8_i32 : i32 to vector<8x512xi32>
    %28 = arith.shrui %26, %27 : vector<8x512xi32>
    %c1677722_i32 = arith.constant 1677722 : i32
    %29 = vector.broadcast %c1677722_i32 : i32 to vector<8x512xi32>
    %30 = arith.cmpi sge, %28, %29 : vector<8x512xi32>
    %cst = arith.constant 1.11111116 : f32
    %31 = vector.broadcast %cst : f32 to vector<8x512xf32>
    %32 = arith.mulf %1, %31 : vector<8x512xf32>
    %cst_5 = arith.constant 0.000000e+00 : f32
    %33 = vector.broadcast %cst_5 : f32 to vector<8x512xf32>
    %34 = arith.select %30, %32, %33 : vector<8x512xi1>, vector<8x512xf32>
    %35 = arith.addf %34, %0 : vector<8x512xf32>
    %c0_6 = arith.constant 0 : index
    %c0_7 = arith.constant 0 : index
    %36 = vector.load %arg4[%c0_6, %c0_7] : memref<8x512xf32, #tpu.memory_space<vmem>>, vector<8x512xf32>
    tpu.vector_store %arg4[%c0_6, %c0_7], %35 {strides = array<i32>} : memref<8x512xf32, #tpu.memory_space<vmem>>, vector<8x512xf32>,
    return
  }
  func.func @transform_0(%arg0: i32, %arg1: memref<1xi32, #tpu.memory_space<smem>>) -> (i32, i32) {
    %c0_i32 = arith.constant 0 : i32
    %c0_i32_0 = arith.constant 0 : i32
    return %arg0, %c0_i32 : i32, i32
  }
  func.func @transform_1(%arg0: i32, %arg1: memref<1xi32, #tpu.memory_space<smem>>) -> (i32, i32) {
    %c0_i32 = arith.constant 0 : i32
    %c0_i32_0 = arith.constant 0 : i32
    return %arg0, %c0_i32 : i32, i32
  }
  func.func @transform_2(%arg0: i32, %arg1: memref<1xi32, #tpu.memory_space<smem>>) -> (i32, i32) {
    %c0_i32 = arith.constant 0 : i32
    %c0_i32_0 = arith.constant 0 : i32
    return %arg0, %c0_i32 : i32, i32
  }
}

</mosaic_0001>

<bundles_post_ra>
// kernel: tpu_custom_call.1
= control target key start
LH: loop header
LB: loop body
LE: loop exit
PB: predicated region body
PF: predicated region fallthrough
CT: control target
= control target key end

     0   :  { %9 = vsyncpa [#allocation5], 0  ;;  %s277_s0 = inlined_call_operand.<no memory space> [shape: s32[1], index: 0, kind: input, shape index: {}]   ;;  %s278_s1 = inlined_call_operand.hbm [shape: f32[8,512], index: 1, kind: input, shape index: {}]   ;;  %s279_s2 = inlined_call_operand.hbm [shape: f32[8,512], index: 2, kind: input, shape index: {}]   ;;  %s280_s3 = inlined_call_operand.hbm [shape: f32[8,512], index: 3, kind: output, shape index: {}]  }
   0x1   :  { %10 = vsyncpa [#allocation8], 0 }
   0x2   :  { %11 = vsyncpa [#allocation6], 0  ;;  %s215_s12 = smov [#allocation4]   ;;  %s216_s14 = smov [#allocation7]  }
   0x3   :  { %s18_s13 = sshll.u32 %s215_s12, 4  ;;  %s28_s15 = sshll.u32 %s216_s14, 4  ;;  %s19_s13 = int_to_ptr.vmem [resolvable:$true] %s18_s13  ;;  %s29_s15 = int_to_ptr.vmem [resolvable:$true] %s28_s15 }
   0x4   :  { %s143_s18 = scalar_lea.hbm %s278_s1, 512 }
   0x5   :  { %p144_p0 = scmp.ne.s32.totalorder %s278_s1, %s143_s18  ;;  %p147_p1 = scmp.lt.u32.totalorder %s143_s18, %s278_s1 }
   0x7   :  { %p149_p2 = pnand %p147_p1, %p144_p0 }
   0x9   :  { %152 = shalt.err (!%p149_p2)
}
   0xa   :  { %s153_s23 = scalar_lea.vmem %s19_s13, 512  ;;  %p158_p4 = scmp.lt.s32.totalorder %s19_s13, %s19_s13 }
   0xb   :  { %p154_p3 = scmp.ne.s32.totalorder %s19_s13, %s153_s23  ;;  %p159_p5 = scmp.lt.s32.totalorder %s153_s23, %s153_s23 }
   0xd   :  { %p160_p6 = por %p159_p5, %p158_p4 }
   0xf   :  { %p161_p7 = pnand %p160_p6, %p154_p3 }
  0x11   :  { %164 = shalt.err (!%p161_p7)
}
  0x12   :  { %21 = dma.hbm_to_vmem [thread:$0]  %s278_s1, 512, %s19_s13, [#allocation5]  }
  0x13   :  { %s165_s28 = scalar_lea.hbm %s279_s2, 512 }
  0x14   :  { %p166_p8 = scmp.ne.s32.totalorder %s279_s2, %s165_s28  ;;  %p169_p9 = scmp.lt.u32.totalorder %s165_s28, %s279_s2 }
  0x16   :  { %p171_p10 = pnand %p169_p9, %p166_p8 }
  0x18   :  { %174 = shalt.err (!%p171_p10)
}
  0x19   :  { %s175_s6 = scalar_lea.vmem %s29_s15, 512  ;;  %p180_p12 = scmp.lt.s32.totalorder %s29_s15, %s29_s15 }
  0x1a   :  { %p176_p11 = scmp.ne.s32.totalorder %s29_s15, %s175_s6  ;;  %p181_p13 = scmp.lt.s32.totalorder %s175_s6, %s175_s6 }
  0x1c   :  { %p182_p0 = por %p181_p13, %p180_p12 }
  0x1e   :  { %p183_p1 = pnand %p182_p0, %p176_p11 }
  0x20   :  { %186 = shalt.err (!%p183_p1)
}
  0x21   :  { %31 = dma.hbm_to_vmem [thread:$0]  %s279_s2, 512, %s29_s15, [#allocation8]  }
  0x22   :  { %209 = dma.done.wait [#allocation5], 512  }
  0x23   :  { %210 = vsyncadd [#allocation5], 4294966784 }
  0x24   :  { %211 = dma.done.wait [#allocation8], 512  }
  0x25   :  { %212 = vsyncadd [#allocation8], 4294966784  ;;  %v47_v0 = vlaneseq  ;;  %s62_s10 = smul.u32 2654435769, %s277_s0  ;;  %v42_v40 = vld [vmem:[#allocation7] sm:$0xff]  ;;  %v43_v42 = vld [vmem:[#allocation7 + $0x8] sm:$0xff] }
  0x26   :  { %v44_v44 = vld [vmem:[#allocation7 + $0x10] sm:$0xff]  ;;  %v45_v46 = vld [vmem:[#allocation7 + $0x18] sm:$0xff]  ;;  %v108_v50 = vmul.f32 1.1111112, %v42_v40  ;;  %v109_v51 = vmul.f32 1.1111112, %v43_v42 }
  0x27   :  { %v48_v1 = vshrl.u32 %v47_v0, 7  ;;  %v50_v2 = vand.u32 127, %v47_v0  ;;  %v63_v7 = vstv %s62_s10  ;;  %v110_v56 = vmul.f32 1.1111112, %v44_v44  ;;  %v38_v58 = vld [vmem:[#allocation4] sm:$0xff]  ;;  %v39_v59 = vld [vmem:[#allocation4 + $0x8] sm:$0xff] }
  0x28   :  { %v111_v57 = vmul.f32 1.1111112, %v45_v46  ;;  %s217_s0 = smov [#allocation9]   ;;  %v40_v62 = vld [vmem:[#allocation4 + $0x10] sm:$0xff]  ;;  %v41_v63 = vld [vmem:[#allocation4 + $0x18] sm:$0xff] }
  0x29   :  { %v54_v3 = vmul.u32 512, %v48_v1  ;;  %v51_v4 = vadd.s32 128, %v50_v2  ;;  %v52_v5 = vadd.s32 256, %v50_v2  ;;  %v53_v6 = vadd.s32 384, %v50_v2  ;;  %s130_s2 = sshll.u32 %s217_s0, 4  ;;  %s131_s2 = int_to_ptr.vmem [resolvable:$true] %s130_s2 }
  0x2a   :  { %s187_s11 = scalar_lea.vmem %s131_s2, 512  ;;  %p192_p3 = scmp.lt.s32.totalorder %s131_s2, %s131_s2 }
  0x2b   :  { %v57_v8 = vadd.s32 %v54_v3, %v50_v2  ;;  %v58_v9 = vadd.s32 %v54_v3, %v51_v4  ;;  %v59_v10 = vadd.s32 %v54_v3, %v52_v5  ;;  %v60_v11 = vadd.s32 %v54_v3, %v53_v6  ;;  %p188_p2 = scmp.ne.s32.totalorder %s131_s2, %s187_s11  ;;  %p193_p4 = scmp.lt.s32.totalorder %s187_s11, %s187_s11 }
  0x2d   :  { %v64_v12 = vxor.u32 %v63_v7, %v57_v8  ;;  %v65_v13 = vxor.u32 %v63_v7, %v58_v9  ;;  %v66_v14 = vxor.u32 %v63_v7, %v59_v10  ;;  %v67_v15 = vxor.u32 %v63_v7, %v60_v11  ;;  %p194_p5 = por %p193_p4, %p192_p3 }
  0x2f   :  { %v68_v16 = vshrl.u32 %v64_v12, 16  ;;  %v69_v17 = vshrl.u32 %v65_v13, 16  ;;  %v70_v18 = vshrl.u32 %v66_v14, 16  ;;  %v71_v19 = vshrl.u32 %v67_v15, 16  ;;  %p195_p6 = pnand %p194_p5, %p188_p2 }
  0x31   :  { %v72_v20 = vxor.u32 %v68_v16, %v64_v12  ;;  %v73_v21 = vxor.u32 %v69_v17, %v65_v13  ;;  %v74_v22 = vxor.u32 %v70_v18, %v66_v14  ;;  %v75_v23 = vxor.u32 %v71_v19, %v67_v15 }
  0x33   :  { %v76_v24 = vmul.u32 2146121005, %v72_v20  ;;  %v77_v25 = vmul.u32 2146121005, %v73_v21 }
  0x34   :  { %v78_v26 = vmul.u32 2146121005, %v74_v22  ;;  %v79_v27 = vmul.u32 2146121005, %v75_v23 }
  0x35   :  { %v80_v28 = vshrl.u32 %v76_v24, 15  ;;  %v81_v29 = vshrl.u32 %v77_v25, 15 }
  0x36   :  { %v82_v30 = vshrl.u32 %v78_v26, 15  ;;  %v83_v31 = vshrl.u32 %v79_v27, 15 }
  0x37   :  { %v84_v32 = vxor.u32 %v80_v28, %v76_v24  ;;  %v85_v33 = vxor.u32 %v81_v29, %v77_v25 }
  0x38   :  { %v86_v34 = vxor.u32 %v82_v30, %v78_v26  ;;  %v87_v35 = vxor.u32 %v83_v31, %v79_v27 }
  0x39   :  { %v88_v36 = vmul.u32 2221713035, %v84_v32  ;;  %v89_v37 = vmul.u32 2221713035, %v85_v33 }
  0x3a   :  { %v90_v38 = vmul.u32 2221713035, %v86_v34  ;;  %v91_v39 = vmul.u32 2221713035, %v87_v35 }
  0x3b   :  { %v92_v41 = vshrl.u32 %v88_v36, 16  ;;  %v93_v43 = vshrl.u32 %v89_v37, 16 }
  0x3c   :  { %v94_v45 = vshrl.u32 %v90_v38, 16  ;;  %v95_v47 = vshrl.u32 %v91_v39, 16 }
  0x3d   :  { %v96_v48 = vxor.u32 %v92_v41, %v88_v36  ;;  %v97_v49 = vxor.u32 %v93_v43, %v89_v37 }
  0x3e   :  { %v98_v52 = vxor.u32 %v94_v45, %v90_v38  ;;  %v99_v53 = vxor.u32 %v95_v47, %v91_v39 }
  0x3f   :  { %v100_v54 = vshrl.u32 %v96_v48, 8  ;;  %v101_v55 = vshrl.u32 %v97_v49, 8 }
  0x40   :  { %v102_v60 = vshrl.u32 %v98_v52, 8  ;;  %v103_v61 = vshrl.u32 %v99_v53, 8 }
  0x41   :  { %vm104_vm0 = vcmp.ge.s32.totalorder %v100_v54, 1677722  ;;  %vm105_vm1 = vcmp.ge.s32.totalorder %v101_v55, 1677722 }
  0x42   :  { %v112_v0 = vsel %vm104_vm0, %v108_v50, 0.0  ;;  %v113_v1 = vsel %vm105_vm1, %v109_v51, 0.0  ;;  %vm106_vm2 = vcmp.ge.s32.totalorder %v102_v60, 1677722  ;;  %vm107_vm3 = vcmp.ge.s32.totalorder %v103_v61, 1677722 }
  0x43   :  { %v116_v2 = vadd.f32 %v112_v0, %v38_v58  ;;  %v117_v3 = vadd.f32 %v113_v1, %v39_v59  ;;  %v114_v4 = vsel %vm106_vm2, %v110_v56, 0.0  ;;  %v115_v5 = vsel %vm107_vm3, %v111_v57, 0.0 }
  0x44   :  { %v118_v6 = vadd.f32 %v114_v4, %v40_v62  ;;  %v119_v7 = vadd.f32 %v115_v5, %v41_v63 }
  0x45   :  { %120 = vst [vmem:[#allocation9] sm:$0xff] %v116_v2  ;;  %121 = vst [vmem:[#allocation9 + $0x8] sm:$0xff] %v117_v3 }
  0x46   :  { %122 = vst [vmem:[#allocation9 + $0x10] sm:$0xff] %v118_v6  ;;  %123 = vst [vmem:[#allocation9 + $0x18] sm:$0xff] %v119_v7 }
  0x47   :  { %198 = shalt.err (!%p195_p6)
}
  0x48   :  { %s199_s14 = scalar_lea.hbm %s280_s3, 512 }
  0x49   :  { %p200_p7 = scmp.ne.s32.totalorder %s280_s3, %s199_s14  ;;  %p203_p8 = scmp.lt.u32.totalorder %s199_s14, %s280_s3 }
  0x4b   :  { %p205_p9 = pnand %p203_p8, %p200_p7 }
  0x4d   :  { %208 = shalt.err (!%p205_p9)
}
  0x4e   :  { %133 = dma.vmem_to_hbm [thread:$0]  %s131_s2, 512, %s280_s3, [#allocation6]  }
  0x4f   :  { %213 = dma.done.wait [#allocation6], 512  }
  0x50   :  { %214 = vsyncadd [#allocation6], 4294966784 }
  0x51   :  { %137 = vsyncpa [#allocation5], 1 }
  0x52   :  { %138 = vsyncpa [#allocation8], 1 }
  0x53   :  { %139 = vsyncpa [#allocation6], 1 }

</bundles_post_ra>
